<compile_context>
chip_gen: v5e
topology: v5e:2x2
jax: 0.10.0
libtpu: 0.0.40
codegen_flags: <defaults>
</compile_context>

<pallas_src>
import functools
import math

import jax
import jax.numpy as jnp
from jax import lax
from jax.experimental import pallas as pl
from jax.experimental.pallas import tpu as pltpu

_LANES = 128
_MAX_VIEW_COLS = 2048   # cap on the lane-dense column width of the 2-D view


def _round_up(x, m):
    return -(-x // m) * m


def _round_down(x, m):
    return (x // m) * m


def _cdiv(a, b):
    return -(-a // b)


def _choose_cols(n):
    """Largest divisor of n that is a multiple of 128 (preferred), capped at
    _MAX_VIEW_COLS; else the largest plain divisor <= cap.  Trace-time only."""
    cap = min(n, _MAX_VIEW_COLS)
    for k in range(cap // _LANES, 0, -1):
        c = k * _LANES
        if n % c == 0:
            return c
    for c in range(cap, 0, -1):
        if n % c == 0:
            return c
    return 1


def _l1_block_kernel(gt_ref, gen_ref, out_ref, *, rows, tr, slab, nslabs,
                     bps, mask_rows, unroll):
    s = pl.program_id(0)          # split (parallel) axis -> private acc slab
    i = pl.program_id(1)          # row-block (reduction) axis within split

    base_row = (s * bps + i) * tr
    if mask_rows:
        row_iota = lax.broadcasted_iota(jnp.int32, (slab, 1), 0)

    def body(k, acc):
        off = k * slab
        if slab % 8 == 0:
            off = pl.multiple_of(off, slab)
        g = gen_ref[pl.ds(off, slab), :].astype(jnp.float32)
        t = gt_ref[pl.ds(off, slab), :].astype(jnp.float32)
        d = jnp.abs(g - t)
        if mask_rows:
            valid = (base_row + off + row_iota) < rows
            d = jnp.where(valid, d, 0.0)
        return acc + d

    part = lax.fori_loop(0, nslabs, body,
                         jnp.zeros(out_ref.shape, jnp.float32),
                         unroll=unroll)

    @pl.when(i == 0)
    def _init():
        out_ref[...] = part

    @pl.when(i != 0)
    def _accum():
        out_ref[...] += part


def _l1_abs_sum(spec_gt, spec_generated):
    """Sum of |spec_generated - spec_gt| over all elements via Pallas."""
    assert spec_gt.shape == spec_generated.shape
    n = math.prod(spec_gt.shape)
    itemsize = jnp.dtype(spec_gt.dtype).itemsize

    cols = _choose_cols(n)
    rows = n // cols
    pad_cols = _round_up(cols, _LANES)

    # Free contiguous reshape -- no pad, no extra HBM traffic.
    gt2 = spec_gt.reshape(rows, cols)
    gen2 = spec_generated.reshape(rows, cols)

    # ---- generation-aware VMEM budget --------------------------------------
    try:
        vmem_cap = int(getattr(pltpu.get_tpu_info(), "vmem_capacity_bytes",
                               64 << 20))
    except Exception:
        vmem_cap = 64 << 20   # conservative default, fits every generation
    # Per-input-block bytes: 2 inputs x 2 pipeline buffers must stay well
    # inside VMEM (v7x has only 64 MiB per core).
    blk_budget = max(512 << 10, min(16 << 20, (vmem_cap * 2 // 5) // 4))

    # ---- tile sizing --------------------------------------------------------
    if rows < 8:
        slab = tr = rows
        nslabs = 1
    else:
        # ~8-16 f32 vregs of work per slab iteration; slab is a multiple of 8.
        slab = max(8, _round_down(8192 // pad_cols, 8) or 8)
        slab = min(slab, _round_down(rows, 8))
        row_bytes = pad_cols * itemsize
        tr = max(slab, _round_down(blk_budget // row_bytes, slab))
        tr = min(tr, _round_down(rows, slab))
        nslabs = tr // slab

    rb = _cdiv(rows, tr)
    # Prefer an even number of row blocks so the "parallel" split axis can
    # feed both v7x TensorCores without ghost blocks (no-op on v5e/v6e).
    if rb >= 2 and rb % 2 == 1 and rows >= 8:
        tr_alt = _round_up(_cdiv(rows, rb + 1), slab)
        if slab <= tr_alt <= tr and _cdiv(rows, tr_alt) % 2 == 0:
            tr = tr_alt
            rb = _cdiv(rows, tr)
            nslabs = tr // slab
    num_splits = 2 if (rb >= 2 and rb % 2 == 0) else 1
    bps = rb // num_splits
    mask_rows = (rows % tr) != 0
    unroll = min(4, nslabs)

    # ---- VMEM limit derived from actual need --------------------------------
    blk_in_bytes = tr * pad_cols * itemsize
    out_blk_bytes = slab * pad_cols * 4
    need = 4 * blk_in_bytes + 4 * out_blk_bytes + (2 << 20)
    vmem_limit = min(max(32 << 20, need), max(32 << 20, int(vmem_cap * 0.85)))

    kernel = functools.partial(
        _l1_block_kernel, rows=rows, tr=tr, slab=slab, nslabs=nslabs,
        bps=bps, mask_rows=mask_rows, unroll=unroll)

    out_rows = num_splits * slab
    cost = pl.CostEstimate(flops=3 * n, transcendentals=0,
                           bytes_accessed=2 * n * itemsize + out_rows * cols * 4)

    partial = pl.pallas_call(
        kernel,
        out_shape=jax.ShapeDtypeStruct((out_rows, cols), jnp.float32),
        grid=(num_splits, bps),
        in_specs=[
            pl.BlockSpec((tr, cols), lambda s, i: (s * bps + i, 0)),
            pl.BlockSpec((tr, cols), lambda s, i: (s * bps + i, 0)),
        ],
        out_specs=pl.BlockSpec((slab, cols), lambda s, i: (s, 0)),
        compiler_params=pltpu.CompilerParams(
            dimension_semantics=("parallel", "arbitrary"),
            vmem_limit_bytes=int(vmem_limit),
        ),
        cost_estimate=cost,
    )(gt2, gen2)

    # Tiny final collapse of the lane/sublane-parallel partial sums.
    return jnp.sum(partial), n


def mel_spectrogram_loss(spec_gt, spec_generated):
    """Equivalent of MelSpectrogramLoss.forward: l1_loss(spec_generated, spec_gt)."""
    total, n_elems = _l1_abs_sum(spec_gt, spec_generated)
    return total / jnp.float32(n_elems)


if __name__ == "__main__":
    key = jax.random.PRNGKey(0)
    k1, k2 = jax.random.split(key)

    # Small mel-spectrogram-shaped inputs: (batch, n_mels, frames).
    spec_gt = jax.random.normal(k1, (2, 8, 32), dtype=jnp.float32)
    spec_generated = jax.random.normal(k2, (2, 8, 32), dtype=jnp.float32)

    loss = jax.block_until_ready(jax.jit(mel_spectrogram_loss)(spec_gt, spec_generated))
    ref = jnp.mean(jnp.abs(spec_generated - spec_gt))
    assert jnp.allclose(loss, ref, rtol=1e-5, atol=1e-6), (loss, ref)

    # Extra shapes: non-128-divisible fallback and multi-slab row loop.
    for shape in ((3, 5, 7), (2, 80, 173)):
        a = jax.random.normal(k1, shape, dtype=jnp.float32)
        b = jax.random.normal(k2, shape, dtype=jnp.float32)
        got = jax.block_until_ready(jax.jit(mel_spectrogram_loss)(a, b))
        want = jnp.mean(jnp.abs(b - a))
        assert jnp.allclose(got, want, rtol=1e-5, atol=1e-6), (shape, got, want)

    print("KERNEL_OK")
</pallas_src>

<mosaic_0001>
module attributes {stable_mosaic.version = 11 : i64} {
  func.func @_l1_block_kernel(%arg0: i32, %arg1: i32, %arg2: memref<1x512xf32, #tpu.memory_space<vmem>>, %arg3: memref<1x512xf32, #tpu.memory_space<vmem>>, %arg4: memref<1x512xf32, #tpu.memory_space<vmem>>) attributes {dimension_semantics = [#tpu.dimension_semantics<parallel>, #tpu.dimension_semantics<arbitrary>], iteration_bounds = array<i64: 1, 1>, scalar_prefetch = 0 : i64, scratch_operands = 0 : i64, tpu.core_type = #tpu.core_type<tc>, window_params = [{transform_indices = @transform_0, window_bounds = array<i64: 1, 512>}, {transform_indices = @transform_1, window_bounds = array<i64: 1, 512>}, {transform_indices = @transform_2, window_bounds = array<i64: 1, 512>}]} {
    %cst = arith.constant 0.000000e+00 : f32
    %0 = vector.broadcast %cst : f32 to vector<1x512xf32>
    %c0_i32 = arith.constant 0 : i32
    %c1_i32 = arith.constant 1 : i32
    %1 = arith.muli %c0_i32, %c1_i32 : i32
    %2 = arith.index_cast %1 : i32 to index
    %c0 = arith.constant 0 : index
    %3 = vector.load %arg3[%2, %c0] : memref<1x512xf32, #tpu.memory_space<vmem>>, vector<1x512xf32>
    %4 = arith.index_cast %1 : i32 to index
    %c0_0 = arith.constant 0 : index
    %5 = vector.load %arg2[%4, %c0_0] : memref<1x512xf32, #tpu.memory_space<vmem>>, vector<1x512xf32>
    %6 = arith.subf %3, %5 : vector<1x512xf32>
    %7 = math.absf %6 : vector<1x512xf32>
    %8 = arith.addf %0, %7 : vector<1x512xf32>
    %c1_i32_1 = arith.constant 1 : i32
    %c0_i32_2 = arith.constant 0 : i32
    %9 = arith.cmpi eq, %arg1, %c0_i32_2 : i32
    %10 = arith.extui %9 : i1 to i32
    %c0_i32_3 = arith.constant 0 : i32
    %11 = arith.cmpi ne, %10, %c0_i32_3 : i32
    scf.if %11 {
      %c0_6 = arith.constant 0 : index
      %c0_7 = arith.constant 0 : index
      %15 = vector.load %arg4[%c0_6, %c0_7] : memref<1x512xf32, #tpu.memory_space<vmem>>, vector<1x512xf32>
      tpu.vector_store %arg4[%c0_6, %c0_7], %8 {strides = array<i32>} : memref<1x512xf32, #tpu.memory_space<vmem>>, vector<1x512xf32>,
    } else {
    }
    %c0_i32_4 = arith.constant 0 : i32
    %12 = arith.cmpi ne, %arg1, %c0_i32_4 : i32
    %13 = arith.extui %12 : i1 to i32
    %c0_i32_5 = arith.constant 0 : i32
    %14 = arith.cmpi ne, %13, %c0_i32_5 : i32
    scf.if %14 {
      %c0_6 = arith.constant 0 : index
      %c0_7 = arith.constant 0 : index
      %15 = vector.load %arg4[%c0_6, %c0_7] : memref<1x512xf32, #tpu.memory_space<vmem>>, vector<1x512xf32>
      %16 = arith.addf %15, %8 : vector<1x512xf32>
      %c0_8 = arith.constant 0 : index
      %c0_9 = arith.constant 0 : index
      %17 = vector.load %arg4[%c0_8, %c0_9] : memref<1x512xf32, #tpu.memory_space<vmem>>, vector<1x512xf32>
      tpu.vector_store %arg4[%c0_8, %c0_9], %16 {strides = array<i32>} : memref<1x512xf32, #tpu.memory_space<vmem>>, vector<1x512xf32>,
    } else {
    }
    return
  }
  func.func @transform_0(%arg0: i32, %arg1: i32) -> (i32, i32) {
    %c1_i32 = arith.constant 1 : i32
    %0 = arith.muli %arg0, %c1_i32 : i32
    %1 = arith.addi %0, %arg1 : i32
    %c0_i32 = arith.constant 0 : i32
    %c0_i32_0 = arith.constant 0 : i32
    return %1, %c0_i32 : i32, i32
  }
  func.func @transform_1(%arg0: i32, %arg1: i32) -> (i32, i32) {
    %c1_i32 = arith.constant 1 : i32
    %0 = arith.muli %arg0, %c1_i32 : i32
    %1 = arith.addi %0, %arg1 : i32
    %c0_i32 = arith.constant 0 : i32
    %c0_i32_0 = arith.constant 0 : i32
    return %1, %c0_i32 : i32, i32
  }
  func.func @transform_2(%arg0: i32, %arg1: i32) -> (i32, i32) {
    %c0_i32 = arith.constant 0 : i32
    %c0_i32_0 = arith.constant 0 : i32
    return %arg0, %c0_i32 : i32, i32
  }
}

</mosaic_0001>

<bundles_post_ra>
// kernel: mel_spectrogram_loss.1
= control target key start
LH: loop header
LB: loop body
LE: loop exit
PB: predicated region body
PF: predicated region fallthrough
CT: control target
= control target key end

     0   :  { %v54_v0 = vlaneseq  ;;  %s110_s0 = inlined_call_operand.vmem [shape: f32[1,512], index: 0, kind: input, shape index: {}]   ;;  %s111_s1 = inlined_call_operand.vmem [shape: f32[1,512], index: 1, kind: input, shape index: {}]   ;;  %s112_s2 = inlined_call_operand.vmem [shape: f32[1,512], index: 2, kind: output, shape index: {}]  }
   0x1   :  { %v45_v1 = vld [vmem:[%s111_s1] sm:$0xf] }
   0x2   :  { %v46_v2 = vld [vmem:[%s110_s0] sm:$0xf]  ;;  %vm56_vm0 = vcmp.lt.s32.totalorder %v54_v0, 512 }
   0x3   :  { %v47_v3 = vsub.f32 %v45_v1, %v46_v2 }
   0x5   :  { %v48_v4 = vand.u32 2147483647, %v47_v3 }
   0x7   :  { %58 = vst.msk [vmem:[%s112_s2] sm:$0xf] %vm56_vm0, %v48_v4 }

</bundles_post_ra>
